<compile_context>
chip_gen: v7x
topology: tpu7x:2x2x1
jax: 0.10.0
libtpu: 0.0.40
codegen_flags: <defaults>
</compile_context>

<pallas_src>
import functools
import math

import jax
import jax.numpy as jnp
from jax.experimental import pallas as pl
from jax.experimental.pallas import tpu as pltpu

LANE = 128
SUBLANE = 8


def _round_up(x: int, m: int) -> int:
    return ((x + m - 1) // m) * m


def _mlp_kernel(*refs, n_layers, in_f, in_pads, out_pads, relu_flags):
    """Fused MLP forward on one batch tile.

    refs layout:
      refs[0]                  x_ref     (TB, in_f)            f32
      refs[1 : 1+L]            w_refs    (in_pads[i], out_pads[i]) bf16 each
      refs[1+L]                b_ref     (L, Pb)               f32
      refs[2+L]                o_ref     (TB, out_pads[-1])    f32
      refs[3+L]                xpad_ref  (TB, in_pads[0])      f32 scratch
    """
    x_ref = refs[0]
    w_refs = refs[1:1 + n_layers]
    b_ref = refs[1 + n_layers]
    o_ref = refs[2 + n_layers]
    xpad_ref = refs[3 + n_layers]

    # Zero-extend the (TB, in_f) input tile to the first layer's padded K width
    # inside VMEM (avoids a wrapper-side pad = extra HBM activation round trip).
    if in_f == in_pads[0]:
        h = x_ref[...].astype(jnp.float32)
    else:
        xpad_ref[...] = jnp.zeros_like(xpad_ref)
        xpad_ref[:, 0:in_f] = x_ref[...].astype(jnp.float32)
        h = xpad_ref[...]

    for i in range(n_layers):                       # static, unrolled
        w = w_refs[i][...]                          # bf16 (in_pad_i, out_pad_i)
        h = jnp.dot(h.astype(jnp.bfloat16), w,
                    preferred_element_type=jnp.float32)
        h = h + b_ref[i:i + 1, 0:out_pads[i]]       # static slice, f32 bias
        if relu_flags[i]:
            h = jnp.maximum(h, 0.0)

    o_ref[...] = h.astype(o_ref.dtype)


class NeuralNetworkPallas:
    """JAX/Pallas equivalent of the PyTorch NeuralNetwork module.

    layers: list of layer widths, e.g. [16, 32, 64, 8].
    Default activations: ReLU on every layer except the last (Identity).
    """

    def __init__(self, layers, key):
        self.layers = list(layers)
        n_layers = len(layers) - 1
        self.n_layers = n_layers
        self.relu_flags = tuple(i < n_layers - 1 for i in range(n_layers))

        # Per-layer 128-lane padded shapes (x @ W layout: (IN, OUT)).
        self.in_pads = tuple(_round_up(layers[i], LANE) for i in range(n_layers))
        self.out_pads = tuple(_round_up(layers[i + 1], LANE) for i in range(n_layers))
        pb = max(self.out_pads)

        self.params = []              # original f32 (w, b) in PyTorch layout
        w_pad = []
        b_stack = jnp.zeros((n_layers, pb), jnp.float32)
        for i in range(n_layers):
            fan_in, fan_out = layers[i], layers[i + 1]
            key, wk, bk = jax.random.split(key, 3)
            # PyTorch nn.Linear default init: U(-1/sqrt(fan_in), 1/sqrt(fan_in))
            bound = 1.0 / math.sqrt(fan_in)
            w = jax.random.uniform(wk, (fan_out, fan_in), jnp.float32,
                                   minval=-bound, maxval=bound)
            b = jax.random.uniform(bk, (fan_out,), jnp.float32,
                                   minval=-bound, maxval=bound)
            self.params.append((w, b))

            # Pre-transposed (IN, OUT), zero-padded, stored in bf16 (MXU fast
            # path; f32 accumulation happens in-kernel).  Zero padding keeps
            # padded lanes at 0 through every layer (bias pad 0, ReLU(0)=0).
            wp = jnp.zeros((self.in_pads[i], self.out_pads[i]), jnp.bfloat16)
            wp = wp.at[:fan_in, :fan_out].set(w.T.astype(jnp.bfloat16))
            w_pad.append(wp)
            b_stack = b_stack.at[i, :fan_out].set(b)

        self.w_pad = w_pad            # list of (in_pad_i, out_pad_i) bf16
        self.b_stack = b_stack        # (L, Pb) f32

    def __call__(self, x):
        batch, in_f = x.shape
        assert in_f == self.layers[0]
        L = self.n_layers
        out_f = self.layers[-1]
        out_pad = self.out_pads[-1]

        # Batch tiling: one tile for small batch; >=2 tiles once batch exceeds
        # a 256-row tile so v7x's 2nd TensorCore gets work; 256-row tiles keep
        # the 256-wide MXU fed at large batch.
        batch_p = _round_up(batch, SUBLANE)
        if batch_p <= 256:
            tb = batch_p
        elif batch_p <= 512:
            tb = _round_up((batch_p + 1) // 2, SUBLANE)
            batch_p = _round_up(batch_p, tb)
        else:
            tb = 256
            batch_p = _round_up(batch_p, tb)

        # Only the batch dim is padded in the wrapper; feature dim stays true
        # width (full-dim block) and is zero-extended in-kernel.
        x_in = x.astype(jnp.float32)
        if batch_p != batch:
            x_in = jnp.pad(x_in, ((0, batch_p - batch), (0, 0)))

        x_spec = pl.BlockSpec((tb, in_f), lambda i: (i, 0))
        w_specs = [
            pl.BlockSpec((ip, op), lambda i: (0, 0),
                         pipeline_mode=pl.Buffered(1))
            for ip, op in zip(self.in_pads, self.out_pads)
        ]
        b_spec = pl.BlockSpec(self.b_stack.shape, lambda i: (0, 0),
                              pipeline_mode=pl.Buffered(1))
        o_spec = pl.BlockSpec((tb, out_pad), lambda i: (i, 0))

        # Cost / VMEM bookkeeping.
        wsum = sum(ip * op for ip, op in zip(self.in_pads, self.out_pads))
        flops = 2 * batch_p * wsum
        weight_bytes = wsum * 2                                   # bf16
        bytes_accessed = (weight_bytes + self.b_stack.size * 4
                          + batch_p * in_f * 4 + batch_p * out_pad * 4)
        cost = pl.CostEstimate(flops=flops, transcendentals=0,
                               bytes_accessed=bytes_accessed)

        vmem_needed = (weight_bytes                     # single-buffered weights
                       + self.b_stack.size * 4          # single-buffered biases
                       + 2 * tb * in_f * 4              # double-buffered x
                       + 2 * tb * out_pad * 4           # double-buffered out
                       + tb * self.in_pads[0] * 4)      # scratch
        vmem_limit = None
        if vmem_needed > 12 * (1 << 20):                # above ~default scoped limits
            vmem_limit = int(min(max(vmem_needed * 5 // 4, 16 << 20), 64 << 20))

        kernel = functools.partial(
            _mlp_kernel, n_layers=L, in_f=in_f,
            in_pads=self.in_pads, out_pads=self.out_pads,
            relu_flags=self.relu_flags)

        out_padded = pl.pallas_call(
            kernel,
            out_shape=jax.ShapeDtypeStruct((batch_p, out_pad), jnp.float32),
            grid=(batch_p // tb,),
            in_specs=[x_spec, *w_specs, b_spec],
            out_specs=o_spec,
            scratch_shapes=[pltpu.VMEM((tb, self.in_pads[0]), jnp.float32)],
            compiler_params=pltpu.CompilerParams(
                dimension_semantics=("parallel",),
                vmem_limit_bytes=vmem_limit,
            ),
            cost_estimate=cost,
        )(x_in, *self.w_pad, self.b_stack)

        return out_padded[:batch, :out_f]


def _reference_forward_f32(model, x):
    """Pure-JAX f32 reference (original PyTorch semantics)."""
    h = x
    for (w, b), relu in zip(model.params, model.relu_flags):
        h = h @ w.T + b
        if relu:
            h = jnp.maximum(h, 0.0)
    return h


def _reference_forward_bf16(model, x):
    """Pure-JAX reference mirroring the kernel's bf16-input / f32-accumulate math."""
    h = x.astype(jnp.float32)
    for (w, b), relu in zip(model.params, model.relu_flags):
        h = jnp.dot(h.astype(jnp.bfloat16), w.T.astype(jnp.bfloat16),
                    preferred_element_type=jnp.float32) + b
        if relu:
            h = jnp.maximum(h, 0.0)
    return h


if __name__ == "__main__":
    key = jax.random.PRNGKey(0)
    layer_widths = [16, 32, 64, 8]   # -> 3 Linear layers: ReLU, ReLU, Identity
    batch = 8

    model = NeuralNetworkPallas(layer_widths, key)

    key, xk = jax.random.split(key)
    x = jax.random.normal(xk, (batch, layer_widths[0]), jnp.float32)

    out = jax.block_until_ready(model(x))
    assert out.shape == (batch, layer_widths[-1])

    # Tight check vs the bf16-weight / f32-accumulate reference (same math).
    ref_bf16 = _reference_forward_bf16(model, x)
    assert jnp.allclose(out, ref_bf16, atol=1e-4, rtol=1e-4)

    # Loose check vs the full-f32 PyTorch-semantics reference (bf16 quantization noise).
    ref_f32 = _reference_forward_f32(model, x)
    assert jnp.allclose(out, ref_f32, atol=1e-1, rtol=1e-1)

    print("KERNEL_OK")
</pallas_src>

<mosaic_0001>
module attributes {stable_mosaic.version = 11 : i64} {
  func.func @_mlp_kernel(%arg0: i32, %arg1: memref<8x16xf32, #tpu.memory_space<vmem>>, %arg2: memref<128x128xbf16, #tpu.memory_space<vmem>>, %arg3: memref<128x128xbf16, #tpu.memory_space<vmem>>, %arg4: memref<128x128xbf16, #tpu.memory_space<vmem>>, %arg5: memref<3x128xf32, #tpu.memory_space<vmem>>, %arg6: memref<8x128xf32, #tpu.memory_space<vmem>>, %arg7: memref<8x128xf32, #tpu.memory_space<vmem>>) attributes {dimension_semantics = [#tpu.dimension_semantics<parallel>], iteration_bounds = array<i64: 1>, scalar_prefetch = 0 : i64, scratch_operands = 1 : i64, tpu.core_type = #tpu.core_type<tc>, window_params = [{transform_indices = @transform_0, window_bounds = array<i64: 8, 16>}, {pipeline_mode = #tpu.pipeline_mode<synchronous>, transform_indices = @transform_1, window_bounds = array<i64: 128, 128>}, {pipeline_mode = #tpu.pipeline_mode<synchronous>, transform_indices = @transform_2, window_bounds = array<i64: 128, 128>}, {pipeline_mode = #tpu.pipeline_mode<synchronous>, transform_indices = @transform_3, window_bounds = array<i64: 128, 128>}, {pipeline_mode = #tpu.pipeline_mode<synchronous>, transform_indices = @transform_4, window_bounds = array<i64: 3, 128>}, {transform_indices = @transform_5, window_bounds = array<i64: 8, 128>}]} {
    %cst = arith.constant 0.000000e+00 : f32
    %0 = vector.broadcast %cst : f32 to vector<8x128xf32>
    %c0 = arith.constant 0 : index
    %c0_0 = arith.constant 0 : index
    %1 = vector.load %arg7[%c0, %c0_0] : memref<8x128xf32, #tpu.memory_space<vmem>>, vector<8x128xf32>
    tpu.vector_store %arg7[%c0, %c0_0], %0 {strides = array<i32>} : memref<8x128xf32, #tpu.memory_space<vmem>>, vector<8x128xf32>,
    %c0_1 = arith.constant 0 : index
    %c0_2 = arith.constant 0 : index
    %2 = vector.load %arg1[%c0_1, %c0_2] : memref<8x16xf32, #tpu.memory_space<vmem>>, vector<8x16xf32>
    %c0_3 = arith.constant 0 : index
    %c0_4 = arith.constant 0 : index
    %3 = vector.load %arg7[%c0_3, %c0_4] : memref<8x128xf32, #tpu.memory_space<vmem>>, vector<8x16xf32>
    tpu.vector_store %arg7[%c0_3, %c0_4], %2 {strides = array<i32>} : memref<8x128xf32, #tpu.memory_space<vmem>>, vector<8x16xf32>,
    %c0_5 = arith.constant 0 : index
    %c0_6 = arith.constant 0 : index
    %4 = vector.load %arg7[%c0_5, %c0_6] : memref<8x128xf32, #tpu.memory_space<vmem>>, vector<8x128xf32>
    %c0_7 = arith.constant 0 : index
    %c0_8 = arith.constant 0 : index
    %5 = vector.load %arg2[%c0_7, %c0_8] : memref<128x128xbf16, #tpu.memory_space<vmem>>, vector<128x128xbf16>
    %6 = arith.truncf %4 : vector<8x128xf32> to vector<8x128xbf16>
    %cst_9 = arith.constant dense<0.000000e+00> : vector<8x128xf32>
    %7 = tpu.matmul %6, %5, %cst_9 {dimension_numbers = #tpu.dot_dimension_numbers<[1], [0], [0], [1], [0, 0, 1, 1], [], []>} : vector<8x128xbf16>, vector<128x128xbf16>, vector<8x128xf32> -> vector<8x128xf32>
    %c0_10 = arith.constant 0 : index
    %c0_11 = arith.constant 0 : index
    %8 = vector.load %arg5[%c0_10, %c0_11] : memref<3x128xf32, #tpu.memory_space<vmem>>, vector<1x128xf32>
    %9 = vector.broadcast %8 : vector<1x128xf32> to vector<8x128xf32>
    %10 = arith.addf %7, %9 : vector<8x128xf32>
    %cst_12 = arith.constant 0.000000e+00 : f32
    %11 = vector.broadcast %cst_12 : f32 to vector<8x128xf32>
    %12 = arith.maximumf %10, %11 : vector<8x128xf32>
    %c0_13 = arith.constant 0 : index
    %c0_14 = arith.constant 0 : index
    %13 = vector.load %arg3[%c0_13, %c0_14] : memref<128x128xbf16, #tpu.memory_space<vmem>>, vector<128x128xbf16>
    %14 = arith.truncf %12 : vector<8x128xf32> to vector<8x128xbf16>
    %cst_15 = arith.constant dense<0.000000e+00> : vector<8x128xf32>
    %15 = tpu.matmul %14, %13, %cst_15 {dimension_numbers = #tpu.dot_dimension_numbers<[1], [0], [0], [1], [0, 0, 1, 1], [], []>} : vector<8x128xbf16>, vector<128x128xbf16>, vector<8x128xf32> -> vector<8x128xf32>
    %c1 = arith.constant 1 : index
    %c0_16 = arith.constant 0 : index
    %16 = vector.load %arg5[%c1, %c0_16] : memref<3x128xf32, #tpu.memory_space<vmem>>, vector<1x128xf32>
    %17 = vector.broadcast %16 : vector<1x128xf32> to vector<8x128xf32>
    %18 = arith.addf %15, %17 : vector<8x128xf32>
    %cst_17 = arith.constant 0.000000e+00 : f32
    %19 = vector.broadcast %cst_17 : f32 to vector<8x128xf32>
    %20 = arith.maximumf %18, %19 : vector<8x128xf32>
    %c0_18 = arith.constant 0 : index
    %c0_19 = arith.constant 0 : index
    %21 = vector.load %arg4[%c0_18, %c0_19] : memref<128x128xbf16, #tpu.memory_space<vmem>>, vector<128x128xbf16>
    %22 = arith.truncf %20 : vector<8x128xf32> to vector<8x128xbf16>
    %cst_20 = arith.constant dense<0.000000e+00> : vector<8x128xf32>
    %23 = tpu.matmul %22, %21, %cst_20 {dimension_numbers = #tpu.dot_dimension_numbers<[1], [0], [0], [1], [0, 0, 1, 1], [], []>} : vector<8x128xbf16>, vector<128x128xbf16>, vector<8x128xf32> -> vector<8x128xf32>
    %c2 = arith.constant 2 : index
    %c0_21 = arith.constant 0 : index
    %24 = vector.load %arg5[%c2, %c0_21] : memref<3x128xf32, #tpu.memory_space<vmem>>, vector<1x128xf32>
    %25 = vector.broadcast %24 : vector<1x128xf32> to vector<8x128xf32>
    %26 = arith.addf %23, %25 : vector<8x128xf32>
    %c0_22 = arith.constant 0 : index
    %c0_23 = arith.constant 0 : index
    %27 = vector.load %arg6[%c0_22, %c0_23] : memref<8x128xf32, #tpu.memory_space<vmem>>, vector<8x128xf32>
    tpu.vector_store %arg6[%c0_22, %c0_23], %26 {strides = array<i32>} : memref<8x128xf32, #tpu.memory_space<vmem>>, vector<8x128xf32>,
    return
  }
  func.func @transform_0(%arg0: i32) -> (i32, i32) {
    %c0_i32 = arith.constant 0 : i32
    %c0_i32_0 = arith.constant 0 : i32
    return %arg0, %c0_i32 : i32, i32
  }
  func.func @transform_1(%arg0: i32) -> (i32, i32) {
    %c0_i32 = arith.constant 0 : i32
    %c0_i32_0 = arith.constant 0 : i32
    %c0_i32_1 = arith.constant 0 : i32
    return %c0_i32, %c0_i32_0 : i32, i32
  }
  func.func @transform_2(%arg0: i32) -> (i32, i32) {
    %c0_i32 = arith.constant 0 : i32
    %c0_i32_0 = arith.constant 0 : i32
    %c0_i32_1 = arith.constant 0 : i32
    return %c0_i32, %c0_i32_0 : i32, i32
  }
  func.func @transform_3(%arg0: i32) -> (i32, i32) {
    %c0_i32 = arith.constant 0 : i32
    %c0_i32_0 = arith.constant 0 : i32
    %c0_i32_1 = arith.constant 0 : i32
    return %c0_i32, %c0_i32_0 : i32, i32
  }
  func.func @transform_4(%arg0: i32) -> (i32, i32) {
    %c0_i32 = arith.constant 0 : i32
    %c0_i32_0 = arith.constant 0 : i32
    %c0_i32_1 = arith.constant 0 : i32
    return %c0_i32, %c0_i32_0 : i32, i32
  }
  func.func @transform_5(%arg0: i32) -> (i32, i32) {
    %c0_i32 = arith.constant 0 : i32
    %c0_i32_0 = arith.constant 0 : i32
    return %arg0, %c0_i32 : i32, i32
  }
}

</mosaic_0001>

<bundles_post_ra>
// kernel: tpu_custom_call.1
= control target key start
LH: loop header
LB: loop body
LE: loop exit
PB: predicated region body
PF: predicated region fallthrough
CT: control target
= control target key end

     0   :  { %10 = vsyncpa [#allocation4], 0  ;;  %s843_s0 = inlined_call_operand.hbm [shape: f32[8,16], index: 0, kind: input, shape index: {}]   ;;  %s844_s1 = inlined_call_operand.hbm [shape: bf16[128,128], index: 1, kind: input, shape index: {}]   ;;  %s845_s2 = inlined_call_operand.hbm [shape: bf16[128,128], index: 2, kind: input, shape index: {}]   ;;  %s846_s3 = inlined_call_operand.hbm [shape: bf16[128,128], index: 3, kind: input, shape index: {}]   ;;  %s847_s4 = inlined_call_operand.vmem [shape: f32[3,128], index: 4, kind: input, shape index: {}]   ;;  %s848_s5 = inlined_call_operand.hbm [shape: f32[8,128], index: 5, kind: output, shape index: {}]  }
   0x1   :  { %11 = vsyncpa [#allocation7], 0 }
   0x2   :  { %12 = vsyncpa [#allocation10], 0 }
   0x3   :  { %13 = vsyncpa [#allocation5], 0  ;;  %s695_s18 = smov [#allocation6]   ;;  %s577_s22 = scalar_lea.hbm %s844_s1, 1024 }
   0x4   :  { %s29_s19 = sshll.u32 %s695_s18, 4  ;;  %p578_p0 = scmp.ne.s32.totalorder %s844_s1, %s577_s22  ;;  %s30_s19 = int_to_ptr.vmem [resolvable:$true] %s29_s19 }
   0x5   :  { %p581_p1 = scmp.lt.u32.totalorder %s577_s22, %s844_s1 }
   0x7   :  { %p583_p2 = pnand %p581_p1, %p578_p0 }
   0x9   :  { %586 = shalt.err (!%p583_p2)
}
   0xa   :  { %s587_s27 = scalar_lea.vmem %s30_s19, 1024  ;;  %p592_p4 = scmp.lt.s32.totalorder %s30_s19, %s30_s19 }
   0xb   :  { %p588_p3 = scmp.ne.s32.totalorder %s30_s19, %s587_s27  ;;  %p593_p5 = scmp.lt.s32.totalorder %s587_s27, %s587_s27 }
   0xd   :  { %p594_p6 = por %p593_p5, %p592_p4 }
   0xf   :  { %p595_p7 = pnand %p594_p6, %p588_p3 }
  0x11   :  { %598 = shalt.err (!%p595_p7)
}
  0x12   :  { %s696_s28 = smov 64   ;;  %s697_s29 = smov 4  }
  0x13   :  { %35 = dma.hbm_to_vmem [thread:$0]  %s844_s1, 1024, %s30_s19, [#allocation7], %s696_s28, %s696_s28, %s697_s29  }
  0x14   :  { %s698_s7 = smov [#allocation3]   ;;  %s699_s9 = smov [#allocation8]  }
  0x15   :  { %s20_s8 = sshll.u32 %s698_s7, 4  ;;  %s41_s10 = sshll.u32 %s699_s9, 4  ;;  %s21_s8 = int_to_ptr.vmem [resolvable:$true] %s20_s8  ;;  %s42_s10 = int_to_ptr.vmem [resolvable:$true] %s41_s10 }
  0x16   :  { %s599_s13 = scalar_lea.hbm %s843_s0, 128 }
  0x17   :  { %p600_p8 = scmp.ne.s32.totalorder %s843_s0, %s599_s13  ;;  %p603_p9 = scmp.lt.u32.totalorder %s599_s13, %s843_s0 }
  0x19   :  { %p605_p10 = pnand %p603_p9, %p600_p8 }
  0x1b   :  { %608 = shalt.err (!%p605_p10)
}
  0x1c   :  { %s609_s1 = scalar_lea.vmem %s21_s8, 128  ;;  %p614_p12 = scmp.lt.s32.totalorder %s21_s8, %s21_s8 }
  0x1d   :  { %p610_p11 = scmp.ne.s32.totalorder %s21_s8, %s609_s1  ;;  %p615_p13 = scmp.lt.s32.totalorder %s609_s1, %s609_s1 }
  0x1f   :  { %p616_p0 = por %p615_p13, %p614_p12 }
  0x21   :  { %p617_p1 = pnand %p616_p0, %p610_p11 }
  0x23   :  { %620 = shalt.err (!%p617_p1)
}
  0x24   :  { %23 = dma.hbm_to_vmem [thread:$0]  %s843_s0, 128, %s21_s8, [#allocation4]  }
  0x25   :  { %s621_s22 = scalar_lea.hbm %s845_s2, 1024 }
  0x26   :  { %p622_p2 = scmp.ne.s32.totalorder %s845_s2, %s621_s22  ;;  %p625_p3 = scmp.lt.u32.totalorder %s621_s22, %s845_s2 }
  0x28   :  { %p627_p4 = pnand %p625_p3, %p622_p2 }
  0x2a   :  { %630 = shalt.err (!%p627_p4)
}
  0x2b   :  { %s631_s27 = scalar_lea.vmem %s42_s10, 1024  ;;  %p636_p6 = scmp.lt.s32.totalorder %s42_s10, %s42_s10 }
  0x2c   :  { %p632_p5 = scmp.ne.s32.totalorder %s42_s10, %s631_s27  ;;  %p637_p7 = scmp.lt.s32.totalorder %s631_s27, %s631_s27 }
  0x2e   :  { %p638_p8 = por %p637_p7, %p636_p6 }
  0x30   :  { %p639_p9 = pnand %p638_p8, %p632_p5 }
  0x32   :  { %642 = shalt.err (!%p639_p9)
}
  0x33   :  { %47 = dma.hbm_to_vmem [thread:$0]  %s845_s2, 1024, %s42_s10, [#allocation7], %s696_s28, %s696_s28, %s697_s29  }
  0x34   :  { %s700_s6 = smov [#allocation9]   ;;  %s643_s11 = scalar_lea.hbm %s846_s3, 1024 }
  0x35   :  { %s53_s7 = sshll.u32 %s700_s6, 4  ;;  %p644_p10 = scmp.ne.s32.totalorder %s846_s3, %s643_s11  ;;  %s54_s7 = int_to_ptr.vmem [resolvable:$true] %s53_s7 }
  0x36   :  { %p647_p11 = scmp.lt.u32.totalorder %s643_s11, %s846_s3 }
  0x38   :  { %p649_p12 = pnand %p647_p11, %p644_p10 }
  0x3a   :  { %652 = shalt.err (!%p649_p12)
}
  0x3b   :  { %s653_s16 = scalar_lea.vmem %s54_s7, 1024  ;;  %p658_p0 = scmp.lt.s32.totalorder %s54_s7, %s54_s7 }
  0x3c   :  { %p654_p13 = scmp.ne.s32.totalorder %s54_s7, %s653_s16  ;;  %p659_p1 = scmp.lt.s32.totalorder %s653_s16, %s653_s16 }
  0x3e   :  { %p660_p2 = por %p659_p1, %p658_p0 }
  0x40   :  { %p661_p3 = pnand %p660_p2, %p654_p13 }
  0x42   :  { %664 = shalt.err (!%p661_p3)
}
  0x43   :  { %59 = dma.hbm_to_vmem [thread:$0]  %s846_s3, 1024, %s54_s7, [#allocation10], %s696_s28, %s696_s28, %s697_s29  }
  0x44   :  { %687 = dma.done.wait [#allocation4], 128  }
  0x45   :  { %688 = vsyncadd [#allocation4], 4294967168 }
  0x46   :  { %689 = dma.done.wait [#allocation7], 2048  }
  0x47   :  { %690 = vsyncadd [#allocation7], 4294965248 }
  0x48   :  { %691 = dma.done.wait [#allocation10], 1024  }
  0x49   :  { %692 = vsyncadd [#allocation10], 4294966272  ;;  %v701_v0 = vmov 0.0   ;;  %vm702_vm0 = vmmov 0   ;;  %v553_v1 = vld [vmem:[#allocation6] sm:$0xff]   ;;  %v554_v2 = vld [vmem:[#allocation6 + $0x8] sm:$0xff]  }
  0x4a   :  { %484 = vmatprep.subr.bf16.mxu0 %v701_v0  ;;  %75 = vst [vmem:[#allocation2] sm:$0xff] %v701_v0  ;;  %500 = vmatprep.mubr.msk.bf16.mxu0 %vm702_vm0, %v701_v0  ;;  %v555_v3 = vld [vmem:[#allocation6 + $0x10] sm:$0xff]   ;;  %vm77_vm1 = vcmask 130048   ;;  %v76_v4 = vld [vmem:[#allocation3] sm:$0xff]  ;;  %v561_v5 = vld [vmem:[#allocation8] sm:$0xff]   ;;  %s703_s19 = smov [#allocation11]  }
  0x4b   :  { %504 = vmatprep.subr.bf16.mxu1 %v701_v0  ;;  %520 = vmatprep.mubr.msk.bf16.mxu1 %vm702_vm0, %v701_v0  ;;  %78 = vst.msk [vmem:[#allocation2] sm:$0xff] %vm77_vm1, %v76_v4  ;;  %v556_v6 = vld [vmem:[#allocation6 + $0x18] sm:$0xff]   ;;  %v562_v7 = vld [vmem:[#allocation8 + $0x8] sm:$0xff]   ;;  %v557_v8 = vld [vmem:[#allocation6 + $0x20] sm:$0xff]   ;;  %s419_s20 = sshll.u32 %s703_s19, 4  ;;  %s420_s20 = int_to_ptr.vmem [resolvable:$true] %s419_s20 }
  0x4c   :  { %485 = vmatpush3.bf16.msra.mxu0 %v553_v1  ;;  %505 = vmatpush3.bf16.msra.mxu1 %v561_v5  ;;  %v563_v9 = vld [vmem:[#allocation8 + $0x10] sm:$0xff]   ;;  %v558_v10 = vld [vmem:[#allocation6 + $0x28] sm:$0xff]   ;;  %v564_v11 = vld [vmem:[#allocation8 + $0x18] sm:$0xff]   ;;  %s665_s21 = scalar_lea.vmem %s420_s20, 128  ;;  %p670_p5 = scmp.lt.s32.totalorder %s420_s20, %s420_s20 }
  0x4d   :  { %486 = vmatprep.subr.bf16.mxu0 %v701_v0  ;;  %506 = vmatprep.subr.bf16.mxu1 %v701_v0  ;;  %v559_v12 = vld [vmem:[#allocation6 + $0x30] sm:$0xff]   ;;  %v565_v13 = vld [vmem:[#allocation8 + $0x20] sm:$0xff]   ;;  %v560_v14 = vld [vmem:[#allocation6 + $0x38] sm:$0xff]   ;;  %p666_p4 = scmp.ne.s32.totalorder %s420_s20, %s665_s21  ;;  %p671_p6 = scmp.lt.s32.totalorder %s665_s21, %s665_s21 }
  0x4e   :  { %v566_v16 = vld [vmem:[#allocation8 + $0x28] sm:$0xff]   ;;  %v567_v18 = vld [vmem:[#allocation8 + $0x30] sm:$0xff]   ;;  %v568_v19 = vld [vmem:[#allocation8 + $0x38] sm:$0xff]  }
  0x4f   :  { %v569_v20 = vld [vmem:[#allocation9] sm:$0xff]   ;;  %v570_v21 = vld [vmem:[#allocation9 + $0x8] sm:$0xff]   ;;  %v571_v22 = vld [vmem:[#allocation9 + $0x10] sm:$0xff]   ;;  %p672_p7 = por %p671_p6, %p670_p5 }
  0x50   :  { %487 = vmatpush3.bf16.msra.mxu0 %v554_v2  ;;  %507 = vmatpush3.bf16.msra.mxu1 %v562_v7  ;;  %v572_v23 = vld [vmem:[#allocation9 + $0x18] sm:$0xff]   ;;  %v573_v24 = vld [vmem:[#allocation9 + $0x20] sm:$0xff]   ;;  %v574_v25 = vld [vmem:[#allocation9 + $0x28] sm:$0xff]  }
  0x51   :  { %488 = vmatprep.subr.bf16.mxu0 %v701_v0  ;;  %508 = vmatprep.subr.bf16.mxu1 %v701_v0  ;;  %v430_v26 = vld [vmem:[%s847_s4] ss:$0 sm:$0xff]  ;;  %v576_v35 = vld [vmem:[#allocation9 + $0x38] sm:$0xff]   ;;  %v439_v36 = vld [vmem:[%s847_s4 + $0x1] ss:$0 sm:$0xff]  ;;  %p673_p8 = pnand %p672_p7, %p666_p4 }
  0x52   :  { %v79_v15 = vld [vmem:[#allocation2] sm:$0xff] }
  0x53   :  { %v96_v17 = vpack.c.bf16 %v79_v15, %v79_v15  ;;  %v575_v34 = vld [vmem:[#allocation9 + $0x30] sm:$0xff]  }
  0x54   :  { %489 = vmatpush3.bf16.msra.mxu0 %v555_v3  ;;  %509 = vmatpush3.bf16.msra.mxu1 %v563_v9  ;;  %v448_v44 = vld [vmem:[%s847_s4 + $0x2] ss:$0 sm:$0xff] }
  0x55   :  { %490 = vmatprep.subr.bf16.mxu0 %v701_v0  ;;  %510 = vmatprep.subr.bf16.mxu1 %v701_v0 }
  0x58   :  { %491 = vmatpush3.bf16.msra.mxu0 %v556_v6  ;;  %511 = vmatpush3.bf16.msra.mxu1 %v564_v11 }
  0x59   :  { %492 = vmatprep.subr.bf16.mxu0 %v701_v0  ;;  %512 = vmatprep.subr.bf16.mxu1 %v701_v0 }
  0x5c   :  { %493 = vmatpush3.bf16.msra.mxu0 %v557_v8  ;;  %513 = vmatpush3.bf16.msra.mxu1 %v565_v13 }
  0x5d   :  { %494 = vmatprep.subr.bf16.mxu0 %v701_v0  ;;  %514 = vmatprep.subr.bf16.mxu1 %v701_v0 }
  0x60   :  { %495 = vmatpush3.bf16.msra.mxu0 %v558_v10  ;;  %515 = vmatpush3.bf16.msra.mxu1 %v566_v16 }
  0x61   :  { %496 = vmatprep.subr.bf16.mxu0 %v701_v0  ;;  %516 = vmatprep.subr.bf16.mxu1 %v701_v0 }
  0x64   :  { %497 = vmatpush3.bf16.msra.mxu0 %v559_v12  ;;  %517 = vmatpush3.bf16.msra.mxu1 %v567_v18 }
  0x65   :  { %498 = vmatprep.subr.bf16.mxu0 %v701_v0  ;;  %518 = vmatprep.subr.bf16.mxu1 %v701_v0 }
  0x68   :  { %499 = vmatpush3.bf16.msra.mxu0 %v560_v14  ;;  %519 = vmatpush3.bf16.msra.mxu1 %v568_v19 }
  0x69   :  { %524 = vmatprep.subr.bf16.mxu0 %v701_v0 }
  0x6b   :  { %501 = vmatmul.mubr.bf16.vlgmr.msra.gmra.mrb[0].mxu0 %v96_v17 }
  0x6c   :  { %540 = vmatprep.mubr.msk.bf16.mxu0 %vm702_vm0, %v701_v0  ;;  %525 = vmatpush3.bf16.msra.mxu0 %v569_v20 }
  0x6d   :  { %526 = vmatprep.subr.bf16.mxu0 %v701_v0 }
  0x70   :  { %527 = vmatpush3.bf16.msra.mxu0 %v570_v21 }
  0x71   :  { %528 = vmatprep.subr.bf16.mxu0 %v701_v0 }
  0x74   :  { %529 = vmatpush3.bf16.msra.mxu0 %v571_v22 }
  0x75   :  { %530 = vmatprep.subr.bf16.mxu0 %v701_v0 }
  0x78   :  { %531 = vmatpush3.bf16.msra.mxu0 %v572_v23 }
  0x79   :  { %532 = vmatprep.subr.bf16.mxu0 %v701_v0 }
  0x7c   :  { %533 = vmatpush3.bf16.msra.mxu0 %v573_v24 }
  0x7d   :  { %534 = vmatprep.subr.bf16.mxu0 %v701_v0 }
  0x80   :  { %535 = vmatpush3.bf16.msra.mxu0 %v574_v25 }
  0x81   :  { %536 = vmatprep.subr.bf16.mxu0 %v701_v0 }
  0x84   :  { %537 = vmatpush3.bf16.msra.mxu0 %v575_v34 }
  0x85   :  { %538 = vmatprep.subr.bf16.mxu0 %v701_v0 }
  0x88   :  { %539 = vmatpush3.bf16.msra.mxu0 %v576_v35 }
 0x13e   :  { %v184_v27 = vpop.f32.mrb[0].mxu0 }
 0x13f   :  { %v185_v28 = vadd.f32 %v430_v26, %v184_v27  ;;  %v502_v29 = vpop.f32.mrb[1].mxu0 }
 0x140   :  { %v187_v30 = vpop.f32.mrb[2].mxu0 }
 0x141   :  { %v190_v31 = vmax.f32 %v185_v28, 0.0  ;;  %v503_v32 = vpop.f32.mrb[3].mxu0 }
 0x143   :  { %v207_v33 = vpack.c.bf16 %v190_v31, %v190_v31 }
 0x145   :  { %521 = vmatmul.mubr.bf16.vlgmr.msra.gmra.mrb[0].mxu1 %v207_v33 }
 0x218   :  { %v295_v37 = vpop.f32.mrb[0].mxu1 }
 0x219   :  { %v296_v38 = vadd.f32 %v439_v36, %v295_v37  ;;  %v522_v39 = vpop.f32.mrb[1].mxu1 }
 0x21a   :  { %v298_v40 = vpop.f32.mrb[2].mxu1 }
 0x21b   :  { %v301_v41 = vmax.f32 %v296_v38, 0.0  ;;  %v523_v42 = vpop.f32.mrb[3].mxu1 }
 0x21d   :  { %v318_v43 = vpack.c.bf16 %v301_v41, %v301_v41 }
 0x21f   :  { %541 = vmatmul.mubr.bf16.vlgmr.msra.gmra.mrb[4].mxu0 %v318_v43 }
 0x2f2   :  { %v406_v45 = vpop.f32.mrb[4].mxu0 }
 0x2f3   :  { %v407_v46 = vadd.f32 %v448_v44, %v406_v45  ;;  %v542_v47 = vpop.f32.mrb[5].mxu0 }
 0x2f4   :  { %v409_v48 = vpop.f32.mrb[6].mxu0 }
 0x2f5   :  { %412 = vst [vmem:[#allocation11] sm:$0xff] %v407_v46  ;;  %v543_v49 = vpop.f32.mrb[7].mxu0 }
 0x2f6   :  { %676 = shalt.err (!%p673_p8)
}
 0x2f7   :  { %s677_s4 = scalar_lea.hbm %s848_s5, 128 }
 0x2f8   :  { %p678_p9 = scmp.ne.s32.totalorder %s848_s5, %s677_s4  ;;  %p681_p10 = scmp.lt.u32.totalorder %s677_s4, %s848_s5 }
 0x2fa   :  { %p683_p11 = pnand %p681_p10, %p678_p9 }
 0x2fc   :  { %686 = shalt.err (!%p683_p11)
}
 0x2fd   :  { %422 = dma.vmem_to_hbm [thread:$0]  %s420_s20, 128, %s848_s5, [#allocation5]  }
 0x2fe   :  { %693 = dma.done.wait [#allocation5], 128  }
 0x2ff   :  { %694 = vsyncadd [#allocation5], 4294967168 }
 0x300   :  { %426 = vsyncpa [#allocation4], 1 }
 0x301   :  { %427 = vsyncpa [#allocation7], 1 }
 0x302   :  { %428 = vsyncpa [#allocation10], 1 }
 0x303   :  { %429 = vsyncpa [#allocation5], 1 }

</bundles_post_ra>
